<compile_context>
chip_gen: v6e
topology: v6e:2x2x1
jax: 0.10.0
libtpu: 0.0.40
codegen_flags: <defaults>
</compile_context>

<pallas_src>
import functools
import math

import jax
import jax.numpy as jnp
from jax import lax
from jax.experimental import pallas as pl
from jax.experimental.pallas import tpu as pltpu

_LANE = 128
_SUB = 8             # f32 sublanes per vreg
_ROW_CHUNK = 32      # rows per inner-loop step (aligned for f32/bf16/int8 packing)
_MAX_TILE_ROWS = 2048  # 2048 x 128 f32 = 1 MiB per input block (well under VMEM limits)


def _round_up(x, m):
    return (x + m - 1) // m * m


def _loss_stats_kernel(x_ref, t_ref, out_ref, *, n_chunks, unroll):
    """Accumulates per-sample reduction stats over the row-tile (K) grid axis.

    Block shapes:
      x_ref, t_ref : (1, R, 128)     one lane/sublane-dense tile of a sample
      out_ref      : (1, 4, 8, 128)  resident accumulator (index constant over k)
                     [0]=sum(x*t) [1]=sum(x*x) [2]=sum(t*t) [3]=sum(BCE terms)
    """
    k = pl.program_id(1)

    @pl.when(k == 0)
    def _():
        out_ref[...] = jnp.zeros_like(out_ref)

    zero = jnp.zeros((_ROW_CHUNK, _LANE), jnp.float32)

    def body(i, carry):
        inter, sx2, st2, bce = carry
        r0 = pl.multiple_of(i * _ROW_CHUNK, _ROW_CHUNK)
        x = x_ref[0, pl.ds(r0, _ROW_CHUNK), :].astype(jnp.float32)
        t = t_ref[0, pl.ds(r0, _ROW_CHUNK), :].astype(jnp.float32)
        inter = inter + x * t
        sx2 = sx2 + x * x
        st2 = st2 + t * t
        # BCE term with PyTorch's clamp(log, -100).  Kept in the general
        # (soft-target) form to preserve the original module semantics.
        log_x = jnp.maximum(jnp.log(x), -100.0)
        log_1mx = jnp.maximum(jnp.log(1.0 - x), -100.0)
        bce = bce - (t * log_x + (1.0 - t) * log_1mx)
        return inter, sx2, st2, bce

    inter, sx2, st2, bce = lax.fori_loop(
        0, n_chunks, body, (zero, zero, zero, zero), unroll=unroll)

    # Fold (32,128) partials down to one vreg (8,128) each via pure VPU adds
    # (no cross-lane/sublane reduction in the kernel).
    def fold(v):
        acc = v[0:_SUB]
        for j in range(1, _ROW_CHUNK // _SUB):
            acc = acc + v[j * _SUB:(j + 1) * _SUB]
        return acc

    out_ref[0, 0] += fold(inter)
    out_ref[0, 1] += fold(sx2)
    out_ref[0, 2] += fold(st2)
    out_ref[0, 3] += fold(bce)


def dice_and_ce_loss(inp, target):
    """Equivalent of Dice_and_CELoss().forward(input, target)."""
    B = inp.shape[0]
    n_elem = math.prod(inp.shape[1:])

    x = inp.reshape(B, n_elem)
    t = target.reshape(B, n_elem)
    if not jnp.issubdtype(t.dtype, jnp.floating):
        # Keep HBM bytes low for bool/int targets; f32 cast happens in-kernel.
        t = t.astype(x.dtype)

    # Lane-dense layout: rows of 128 lanes, tiled into R-row blocks; reduction
    # over row tiles handled by the second ("arbitrary") grid axis.
    rows = pl.cdiv(n_elem, _LANE)
    tile_rows = min(_MAX_TILE_ROWS, _round_up(rows, _ROW_CHUNK))

    # v7x has 2 TensorCores/chip; guarantee >=2 units of parallel grid work.
    splits = 2 if B == 1 else 1

    rows_padded = _round_up(rows, tile_rows * splits)
    n_padded = rows_padded * _LANE
    if n_padded != n_elem:
        # Zero padding is inert: (x=0, t=0) contributes 0 to every statistic.
        pad = ((0, 0), (0, n_padded - n_elem))
        x = jnp.pad(x, pad)
        t = jnp.pad(t, pad)

    bs = B * splits
    rows_per_split = rows_padded // splits
    x = x.reshape(bs, rows_per_split, _LANE)
    t = t.reshape(bs, rows_per_split, _LANE)
    k_tiles = rows_per_split // tile_rows

    n_chunks = tile_rows // _ROW_CHUNK
    unroll = next(u for u in (8, 4, 2, 1) if n_chunks % u == 0)
    if n_chunks <= 8:
        unroll = n_chunks

    kernel = functools.partial(_loss_stats_kernel, n_chunks=n_chunks, unroll=unroll)

    stats = pl.pallas_call(
        kernel,
        out_shape=jax.ShapeDtypeStruct((bs, 4, _SUB, _LANE), jnp.float32),
        grid_spec=pltpu.PrefetchScalarGridSpec(
            num_scalar_prefetch=0,
            grid=(bs, k_tiles),
            in_specs=[
                pl.BlockSpec((1, tile_rows, _LANE), lambda b, k: (b, k, 0)),
                pl.BlockSpec((1, tile_rows, _LANE), lambda b, k: (b, k, 0)),
            ],
            out_specs=pl.BlockSpec((1, 4, _SUB, _LANE), lambda b, k: (b, 0, 0, 0)),
        ),
        compiler_params=pltpu.CompilerParams(
            dimension_semantics=("parallel", "arbitrary")),
    )(x, t)

    # Tiny scalar epilogue in plain JAX.
    per_bs = jnp.sum(stats, axis=(2, 3))                    # (B*splits, 4)
    per_sample = per_bs.reshape(B, splits, 4).sum(axis=1)   # (B, 4)
    intersect = per_sample[:, 0]
    sum_x2 = per_sample[:, 1]
    sum_t2 = per_sample[:, 2]
    bce_sum = per_sample[:, 3]

    smooth = 1.0
    dice_loss = jnp.mean(
        1.0 - (2.0 * intersect + smooth) / (sum_x2 + sum_t2 + smooth))
    bce_loss = jnp.sum(bce_sum) / (B * n_elem)   # BCELoss: mean over all elements
    return dice_loss + bce_loss


def _reference_loss(inp, target):
    x = inp.reshape(inp.shape[0], -1).astype(jnp.float32)
    t = target.reshape(target.shape[0], -1).astype(jnp.float32)
    intersect = jnp.sum(x * t, axis=1)
    union = jnp.sum(x * x, axis=1) + jnp.sum(t * t, axis=1)
    dice = jnp.mean(1.0 - (2.0 * intersect + 1.0) / (union + 1.0))
    bce = jnp.mean(-(t * jnp.maximum(jnp.log(x), -100.0)
                     + (1.0 - t) * jnp.maximum(jnp.log(1.0 - x), -100.0)))
    return dice + bce


if __name__ == "__main__":
    key = jax.random.PRNGKey(0)
    k1, k2 = jax.random.split(key)

    B, C, H, W = 2, 4, 16, 16
    # Probabilities in (0, 1) for the "input" (as BCELoss expects), binary target.
    inp = jax.nn.sigmoid(jax.random.normal(k1, (B, C, H, W), dtype=jnp.float32))
    target = (jax.random.uniform(k2, (B, C, H, W)) > 0.5).astype(jnp.float32)

    loss = dice_and_ce_loss(inp, target)
    jax.block_until_ready(loss)
    ref = _reference_loss(inp, target)
    assert jnp.allclose(loss, ref, rtol=1e-5, atol=1e-5), (loss, ref)

    # Also exercise the B == 1 path (two parallel split-partials for v7x).
    loss1 = dice_and_ce_loss(inp[:1], target[:1])
    jax.block_until_ready(loss1)
    ref1 = _reference_loss(inp[:1], target[:1])
    assert jnp.allclose(loss1, ref1, rtol=1e-5, atol=1e-5), (loss1, ref1)

    print("KERNEL_OK")
</pallas_src>

<mosaic_0001>
module attributes {stable_mosaic.version = 11 : i64} {
  func.func @_loss_stats_kernel(%arg0: i32, %arg1: i32, %arg2: memref<1x32x128xf32, #tpu.memory_space<vmem>>, %arg3: memref<1x32x128xf32, #tpu.memory_space<vmem>>, %arg4: memref<1x4x8x128xf32, #tpu.memory_space<vmem>>) attributes {dimension_semantics = [#tpu.dimension_semantics<parallel>, #tpu.dimension_semantics<arbitrary>], iteration_bounds = array<i64: 2, 1>, scalar_prefetch = 0 : i64, scratch_operands = 0 : i64, tpu.core_type = #tpu.core_type<tc>, window_params = [{transform_indices = @transform_0, window_bounds = array<i64: 1, 32, 128>}, {transform_indices = @transform_1, window_bounds = array<i64: 1, 32, 128>}, {transform_indices = @transform_2, window_bounds = array<i64: 1, 4, 8, 128>}]} {
    %c0_i32 = arith.constant 0 : i32
    %0 = arith.cmpi eq, %arg1, %c0_i32 : i32
    %1 = arith.extui %0 : i1 to i32
    %c0_i32_0 = arith.constant 0 : i32
    %2 = arith.cmpi ne, %1, %c0_i32_0 : i32
    scf.if %2 {
      %cst_38 = arith.constant 0.000000e+00 : f32
      %84 = vector.broadcast %cst_38 : f32 to vector<1x4x8x128xf32>
      %c0_39 = arith.constant 0 : index
      %c0_40 = arith.constant 0 : index
      %c0_41 = arith.constant 0 : index
      %c0_42 = arith.constant 0 : index
      %85 = vector.load %arg4[%c0_39, %c0_40, %c0_41, %c0_42] : memref<1x4x8x128xf32, #tpu.memory_space<vmem>>, vector<1x4x8x128xf32>
      tpu.vector_store %arg4[%c0_39, %c0_40, %c0_41, %c0_42], %84 {strides = array<i32>} : memref<1x4x8x128xf32, #tpu.memory_space<vmem>>, vector<1x4x8x128xf32>,
    } else {
    }
    %cst = arith.constant 0.000000e+00 : f32
    %3 = vector.broadcast %cst : f32 to vector<32x128xf32>
    %c0_i32_1 = arith.constant 0 : i32
    %c32_i32 = arith.constant 32 : i32
    %4 = arith.muli %c0_i32_1, %c32_i32 : i32
    %5 = tpu.assume_multiple %4, 32 : i32
    %c0 = arith.constant 0 : index
    %6 = arith.index_cast %5 : i32 to index
    %c0_2 = arith.constant 0 : index
    %7 = vector.load %arg2[%c0, %6, %c0_2] : memref<1x32x128xf32, #tpu.memory_space<vmem>>, vector<1x32x128xf32>
    %8 = vector.shape_cast %7 : vector<1x32x128xf32> to vector<32x128xf32>
    %c0_3 = arith.constant 0 : index
    %9 = arith.index_cast %5 : i32 to index
    %c0_4 = arith.constant 0 : index
    %10 = vector.load %arg3[%c0_3, %9, %c0_4] : memref<1x32x128xf32, #tpu.memory_space<vmem>>, vector<1x32x128xf32>
    %11 = vector.shape_cast %10 : vector<1x32x128xf32> to vector<32x128xf32>
    %12 = arith.mulf %8, %11 : vector<32x128xf32>
    %13 = arith.addf %3, %12 : vector<32x128xf32>
    %14 = arith.mulf %8, %8 : vector<32x128xf32>
    %15 = arith.addf %3, %14 : vector<32x128xf32>
    %16 = arith.mulf %11, %11 : vector<32x128xf32>
    %17 = arith.addf %3, %16 : vector<32x128xf32>
    %18 = math.log %8 : vector<32x128xf32>
    %cst_5 = arith.constant -1.000000e+02 : f32
    %19 = vector.broadcast %cst_5 : f32 to vector<32x128xf32>
    %20 = arith.maximumf %18, %19 : vector<32x128xf32>
    %cst_6 = arith.constant 1.000000e+00 : f32
    %21 = vector.broadcast %cst_6 : f32 to vector<32x128xf32>
    %22 = arith.subf %21, %8 : vector<32x128xf32>
    %23 = math.log %22 : vector<32x128xf32>
    %cst_7 = arith.constant -1.000000e+02 : f32
    %24 = vector.broadcast %cst_7 : f32 to vector<32x128xf32>
    %25 = arith.maximumf %23, %24 : vector<32x128xf32>
    %26 = arith.mulf %11, %20 : vector<32x128xf32>
    %cst_8 = arith.constant 1.000000e+00 : f32
    %27 = vector.broadcast %cst_8 : f32 to vector<32x128xf32>
    %28 = arith.subf %27, %11 : vector<32x128xf32>
    %29 = arith.mulf %28, %25 : vector<32x128xf32>
    %30 = arith.addf %26, %29 : vector<32x128xf32>
    %31 = arith.subf %3, %30 : vector<32x128xf32>
    %c1_i32 = arith.constant 1 : i32
    %c0_9 = arith.constant 0 : index
    %c0_10 = arith.constant 0 : index
    %c0_11 = arith.constant 0 : index
    %c0_12 = arith.constant 0 : index
    %32 = vector.load %arg4[%c0_9, %c0_10, %c0_11, %c0_12] : memref<1x4x8x128xf32, #tpu.memory_space<vmem>>, vector<1x1x8x128xf32>
    %33 = vector.shape_cast %32 : vector<1x1x8x128xf32> to vector<8x128xf32>
    %34 = vector.extract_strided_slice %13 {offsets = [0, 0], sizes = [8, 128], strides = [1, 1]} : vector<32x128xf32> to vector<8x128xf32>
    %35 = vector.extract_strided_slice %13 {offsets = [8, 0], sizes = [8, 128], strides = [1, 1]} : vector<32x128xf32> to vector<8x128xf32>
    %36 = arith.addf %34, %35 : vector<8x128xf32>
    %37 = vector.extract_strided_slice %13 {offsets = [16, 0], sizes = [8, 128], strides = [1, 1]} : vector<32x128xf32> to vector<8x128xf32>
    %38 = arith.addf %36, %37 : vector<8x128xf32>
    %39 = vector.extract_strided_slice %13 {offsets = [24, 0], sizes = [8, 128], strides = [1, 1]} : vector<32x128xf32> to vector<8x128xf32>
    %40 = arith.addf %38, %39 : vector<8x128xf32>
    %41 = arith.addf %33, %40 : vector<8x128xf32>
    %c0_13 = arith.constant 0 : index
    %c0_14 = arith.constant 0 : index
    %c0_15 = arith.constant 0 : index
    %c0_16 = arith.constant 0 : index
    %42 = vector.load %arg4[%c0_13, %c0_14, %c0_15, %c0_16] : memref<1x4x8x128xf32, #tpu.memory_space<vmem>>, vector<1x1x8x128xf32>
    %43 = vector.shape_cast %42 : vector<1x1x8x128xf32> to vector<8x128xf32>
    %44 = vector.shape_cast %41 : vector<8x128xf32> to vector<1x1x8x128xf32>
    tpu.vector_store %arg4[%c0_13, %c0_14, %c0_15, %c0_16], %44 {strides = array<i32>} : memref<1x4x8x128xf32, #tpu.memory_space<vmem>>, vector<1x1x8x128xf32>,
    %c0_17 = arith.constant 0 : index
    %c1 = arith.constant 1 : index
    %c0_18 = arith.constant 0 : index
    %c0_19 = arith.constant 0 : index
    %45 = vector.load %arg4[%c0_17, %c1, %c0_18, %c0_19] : memref<1x4x8x128xf32, #tpu.memory_space<vmem>>, vector<1x1x8x128xf32>
    %46 = vector.shape_cast %45 : vector<1x1x8x128xf32> to vector<8x128xf32>
    %47 = vector.extract_strided_slice %15 {offsets = [0, 0], sizes = [8, 128], strides = [1, 1]} : vector<32x128xf32> to vector<8x128xf32>
    %48 = vector.extract_strided_slice %15 {offsets = [8, 0], sizes = [8, 128], strides = [1, 1]} : vector<32x128xf32> to vector<8x128xf32>
    %49 = arith.addf %47, %48 : vector<8x128xf32>
    %50 = vector.extract_strided_slice %15 {offsets = [16, 0], sizes = [8, 128], strides = [1, 1]} : vector<32x128xf32> to vector<8x128xf32>
    %51 = arith.addf %49, %50 : vector<8x128xf32>
    %52 = vector.extract_strided_slice %15 {offsets = [24, 0], sizes = [8, 128], strides = [1, 1]} : vector<32x128xf32> to vector<8x128xf32>
    %53 = arith.addf %51, %52 : vector<8x128xf32>
    %54 = arith.addf %46, %53 : vector<8x128xf32>
    %c0_20 = arith.constant 0 : index
    %c1_21 = arith.constant 1 : index
    %c0_22 = arith.constant 0 : index
    %c0_23 = arith.constant 0 : index
    %55 = vector.load %arg4[%c0_20, %c1_21, %c0_22, %c0_23] : memref<1x4x8x128xf32, #tpu.memory_space<vmem>>, vector<1x1x8x128xf32>
    %56 = vector.shape_cast %55 : vector<1x1x8x128xf32> to vector<8x128xf32>
    %57 = vector.shape_cast %54 : vector<8x128xf32> to vector<1x1x8x128xf32>
    tpu.vector_store %arg4[%c0_20, %c1_21, %c0_22, %c0_23], %57 {strides = array<i32>} : memref<1x4x8x128xf32, #tpu.memory_space<vmem>>, vector<1x1x8x128xf32>,
    %c0_24 = arith.constant 0 : index
    %c2 = arith.constant 2 : index
    %c0_25 = arith.constant 0 : index
    %c0_26 = arith.constant 0 : index
    %58 = vector.load %arg4[%c0_24, %c2, %c0_25, %c0_26] : memref<1x4x8x128xf32, #tpu.memory_space<vmem>>, vector<1x1x8x128xf32>
    %59 = vector.shape_cast %58 : vector<1x1x8x128xf32> to vector<8x128xf32>
    %60 = vector.extract_strided_slice %17 {offsets = [0, 0], sizes = [8, 128], strides = [1, 1]} : vector<32x128xf32> to vector<8x128xf32>
    %61 = vector.extract_strided_slice %17 {offsets = [8, 0], sizes = [8, 128], strides = [1, 1]} : vector<32x128xf32> to vector<8x128xf32>
    %62 = arith.addf %60, %61 : vector<8x128xf32>
    %63 = vector.extract_strided_slice %17 {offsets = [16, 0], sizes = [8, 128], strides = [1, 1]} : vector<32x128xf32> to vector<8x128xf32>
    %64 = arith.addf %62, %63 : vector<8x128xf32>
    %65 = vector.extract_strided_slice %17 {offsets = [24, 0], sizes = [8, 128], strides = [1, 1]} : vector<32x128xf32> to vector<8x128xf32>
    %66 = arith.addf %64, %65 : vector<8x128xf32>
    %67 = arith.addf %59, %66 : vector<8x128xf32>
    %c0_27 = arith.constant 0 : index
    %c2_28 = arith.constant 2 : index
    %c0_29 = arith.constant 0 : index
    %c0_30 = arith.constant 0 : index
    %68 = vector.load %arg4[%c0_27, %c2_28, %c0_29, %c0_30] : memref<1x4x8x128xf32, #tpu.memory_space<vmem>>, vector<1x1x8x128xf32>
    %69 = vector.shape_cast %68 : vector<1x1x8x128xf32> to vector<8x128xf32>
    %70 = vector.shape_cast %67 : vector<8x128xf32> to vector<1x1x8x128xf32>
    tpu.vector_store %arg4[%c0_27, %c2_28, %c0_29, %c0_30], %70 {strides = array<i32>} : memref<1x4x8x128xf32, #tpu.memory_space<vmem>>, vector<1x1x8x128xf32>,
    %c0_31 = arith.constant 0 : index
    %c3 = arith.constant 3 : index
    %c0_32 = arith.constant 0 : index
    %c0_33 = arith.constant 0 : index
    %71 = vector.load %arg4[%c0_31, %c3, %c0_32, %c0_33] : memref<1x4x8x128xf32, #tpu.memory_space<vmem>>, vector<1x1x8x128xf32>
    %72 = vector.shape_cast %71 : vector<1x1x8x128xf32> to vector<8x128xf32>
    %73 = vector.extract_strided_slice %31 {offsets = [0, 0], sizes = [8, 128], strides = [1, 1]} : vector<32x128xf32> to vector<8x128xf32>
    %74 = vector.extract_strided_slice %31 {offsets = [8, 0], sizes = [8, 128], strides = [1, 1]} : vector<32x128xf32> to vector<8x128xf32>
    %75 = arith.addf %73, %74 : vector<8x128xf32>
    %76 = vector.extract_strided_slice %31 {offsets = [16, 0], sizes = [8, 128], strides = [1, 1]} : vector<32x128xf32> to vector<8x128xf32>
    %77 = arith.addf %75, %76 : vector<8x128xf32>
    %78 = vector.extract_strided_slice %31 {offsets = [24, 0], sizes = [8, 128], strides = [1, 1]} : vector<32x128xf32> to vector<8x128xf32>
    %79 = arith.addf %77, %78 : vector<8x128xf32>
    %80 = arith.addf %72, %79 : vector<8x128xf32>
    %c0_34 = arith.constant 0 : index
    %c3_35 = arith.constant 3 : index
    %c0_36 = arith.constant 0 : index
    %c0_37 = arith.constant 0 : index
    %81 = vector.load %arg4[%c0_34, %c3_35, %c0_36, %c0_37] : memref<1x4x8x128xf32, #tpu.memory_space<vmem>>, vector<1x1x8x128xf32>
    %82 = vector.shape_cast %81 : vector<1x1x8x128xf32> to vector<8x128xf32>
    %83 = vector.shape_cast %80 : vector<8x128xf32> to vector<1x1x8x128xf32>
    tpu.vector_store %arg4[%c0_34, %c3_35, %c0_36, %c0_37], %83 {strides = array<i32>} : memref<1x4x8x128xf32, #tpu.memory_space<vmem>>, vector<1x1x8x128xf32>,
    return
  }
  func.func @transform_0(%arg0: i32, %arg1: i32) -> (i32, i32, i32) {
    %c0_i32 = arith.constant 0 : i32
    %c0_i32_0 = arith.constant 0 : i32
    return %arg0, %arg1, %c0_i32 : i32, i32, i32
  }
  func.func @transform_1(%arg0: i32, %arg1: i32) -> (i32, i32, i32) {
    %c0_i32 = arith.constant 0 : i32
    %c0_i32_0 = arith.constant 0 : i32
    return %arg0, %arg1, %c0_i32 : i32, i32, i32
  }
  func.func @transform_2(%arg0: i32, %arg1: i32) -> (i32, i32, i32, i32) {
    %c0_i32 = arith.constant 0 : i32
    %c0_i32_0 = arith.constant 0 : i32
    %c0_i32_1 = arith.constant 0 : i32
    %c0_i32_2 = arith.constant 0 : i32
    return %arg0, %c0_i32, %c0_i32_0, %c0_i32_1 : i32, i32, i32, i32
  }
}

</mosaic_0001>

<bundles_post_ra>
// kernel: tpu_custom_call.1
= control target key start
LH: loop header
LB: loop body
LE: loop exit
PB: predicated region body
PF: predicated region fallthrough
CT: control target
= control target key end

     0   :  { %7 = vsyncpa [#allocation3], 0  ;;  %s964_s0 = inlined_call_operand.hbm [shape: f32[2,32,128], index: 0, kind: input, shape index: {}]   ;;  %s965_s1 = inlined_call_operand.hbm [shape: f32[2,32,128], index: 1, kind: input, shape index: {}]   ;;  %s966_s2 = inlined_call_operand.hbm [shape: f32[2,4,8,128], index: 2, kind: output, shape index: {}]  }
   0x1   :  { %9 = vsyncpa [#allocation3 + $0x1], 0 }
   0x2   :  { %10 = vsyncpa [#allocation6], 0 }
   0x3   :  { %12 = vsyncpa [#allocation6 + $0x1], 0 }
   0x4   :  { %13 = vsyncpa [#allocation4], 0 }
   0x5   :  { %15 = vsyncpa [#allocation4 + $0x1], 0  ;;  %s743_s9 = smov 0   ;;  %s745_s10 = smov 0  }
   0x6   :  { %s747_s11 = smov 0   ;;  %s749_s12 = smov 0  }
   0x7   :  { %s751_s13 = smov 0   ;;  %s753_s14 = smov 0  }
   0x8 LB: > { %s463_s15 = sadd.s32 4294967295, %s719_s14   ;;  %s464_s16 = sadd.s32 4294967294, %s719_s14   ;;  %s719_s14 = sphi %s753_s14, %s21_s14   ;;  %s715_s13 = sphi %s751_s13, %s977_s13   ;;  %s711_s12 = sphi %s749_s12, %s976_s12   ;;  %s707_s11 = sphi %s747_s11, %s975_s11   ;;  %s703_s10 = sphi %s745_s10, %s974_s10   ;;  %s699_s9 = sphi %s743_s9, %s973_s9  }
   0x9   : > { %s33_s17 = sadd.s32 1, %s715_s13  ;;  %s42_s18 = sadd.s32 1, %s707_s11 }
   0xa   : > { %p35_p0 = scmp.ge.s32.totalorder %s33_s17, 2  ;;  %p49_p1 = scmp.ne.s32.totalorder %s707_s11, %s703_s10 }
   0xb   : > { %p50_p2 = scmp.eq.s32.totalorder %s719_s14, 0  ;;  %p55_p3 = scmp.ne.s32.totalorder %s703_s10, %s699_s9 }
   0xc   : > { %s979_s17 = smov (%p35_p0, %s33_s17), 0  ;;  %p56_p5 = scmp.eq.s32.totalorder %s463_s15, 0 }
   0xd   : > { %p784_p4 = por %p50_p2, %p49_p1  ;;  %s37_s20 = ssub.s32 %s715_s13, %s979_s17 }
   0xe   : > { %p107_p6 = scmp.eq.s32.totalorder %s463_s15, 1  ;;  %p40_p7 = scmp.eq.s32.totalorder %s37_s20, 0 }
   0xf   : > { %p790_p8 = por %p56_p5, %p55_p3  ;;  %p113_p10 = scmp.eq.s32.totalorder %s464_s16, 1 }
  0x10   : > { %p794_p9 = por %p107_p6, %p49_p1  ;;  %p466_p12 = scmp.ge.s32.totalorder %s719_s14, 2 }
  0x11   : > { %s799_s23 = scalar_select %p40_p7, %s707_s11, %s42_s18  }
  0x12   : > { %p801_p11 = por %p113_p10, %p55_p3  ;;  %p508_p13 = scmp.lt.s32.totalorder %s719_s14, 2 }
  0x13   : > { %s808_s25 = sand.u32 1, %s707_s11   ;;  %s488_s27 = sshll.u32 %s715_s13, 9 }
  0x14   : > { %s467_s26 = sshll.u32 %s808_s25, 5  ;;  %s145_s30 = scalar_lea.hbm %s964_s0, %s488_s27 }
  0x15   : > { %s137_s3 = scalar_lea.vmem [#allocation2], %s467_s26  ;;  %p821_p0 = pnand %p508_p13, %p784_p4 }
  0x16   : > { %s146_s4 = sshll.u32 %s137_s3, 4  ;;  %p473_p1 = scmp.ge.s32.totalorder %s719_s14, 1  ;;  %s147_s4 = int_to_ptr.vmem [resolvable:$true] %s146_s4 }
  0x17   : > { %s134_s6 = scalar_lea.sflag [#allocation3], %s808_s25  ;;  %p581_p2 = pneg %p821_p0 }
  0x18   : > { %s592_s7 = scalar_lea.vmem %s147_s4, 512  ;;  %s721_s8 = smov [#allocation2]  }
  0x19   : > { %p593_p3 = scmp.ne.s32.totalorder %s147_s4, %s592_s7  ;;  %s597_s15 = sshll.u32 %s721_s8, 4  ;;  %s598_s15 = int_to_ptr.vmem [resolvable:$false] %s597_s15 }
  0x1a   : > { %s599_s16 = scalar_lea.vmem %s598_s15, 1024  ;;  %p600_p4 = scmp.lt.s32.totalorder %s147_s4, %s598_s15 }
  0x1b   : > { %p595_p5 = pnand %p593_p3, %p581_p2  ;;  %p601_p7 = scmp.lt.s32.totalorder %s599_s16, %s592_s7 }
  0x1d   : > { %p596_p6 = pneg %p595_p5  ;;  %p602_p10 = por %p601_p7, %p600_p4 }
  0x1f   : > { %p603_p13 = pnand %p602_p10, %p596_p6 }
  0x21   : > { %606 = shalt.err (!%p603_p13)
}
  0x22   : > { %s722_s18 = smov 128   ;;  %s723_s19 = smov 8  }
  0x23   : > { %500 = dma.hbm_to_vmem [thread:$0]  (!%p821_p0), %s145_s30, 512, %s147_s4, %s134_s6, %s722_s18, %s722_s18, %s723_s19  }
  0x24   : > { %p177_p3 = scmp.lt.s32.totalorder %s719_s14, 3  ;;  %s168_s29 = scalar_lea.hbm %s965_s1, %s488_s27 }
  0x25   : > { %s160_s7 = scalar_lea.vmem [#allocation5], %s467_s26  ;;  %s157_s15 = scalar_lea.sflag [#allocation6], %s808_s25 }
  0x26   : > { %p842_p5 = pnand %p473_p1, %p177_p3  ;;  %s169_s8 = sshll.u32 %s160_s7, 4  ;;  %s170_s8 = int_to_ptr.vmem [resolvable:$true] %s169_s8 }
  0x27   : > { %s620_s16 = scalar_lea.vmem %s170_s8, 512  ;;  %s724_s30 = smov [#allocation5]  }
  0x28   : > { %p621_p6 = scmp.ne.s32.totalorder %s170_s8, %s620_s16  ;;  %s625_s4 = sshll.u32 %s724_s30, 4  ;;  %s626_s4 = int_to_ptr.vmem [resolvable:$false] %s625_s4 }
  0x29   : > { %s627_s27 = scalar_lea.vmem %s626_s4, 1024  ;;  %p628_p10 = scmp.lt.s32.totalorder %s170_s8, %s626_s4 }
  0x2a   : > { %p623_p4 = pnand %p621_p6, %p581_p2  ;;  %p629_p1 = scmp.lt.s32.totalorder %s627_s27, %s620_s16 }
  0x2c   : > { %p624_p7 = pneg %p623_p4  ;;  %p630_p13 = por %p629_p1, %p628_p10 }
  0x2e   : > { %p631_p3 = pnand %p630_p13, %p624_p7 }
  0x30   : > { %634 = shalt.err (!%p631_p3)
}
  0x31   : > { %503 = dma.hbm_to_vmem [thread:$0]  (!%p821_p0), %s168_s29, 512, %s170_s8, %s157_s15, %s722_s18, %s722_s18, %s723_s19  }
  0x32   : > { %181 = sbr.rel (%p842_p5) target bundleno = 109 (0x6d), region = 28  ;;  %s857_s25 = sand.u32 (!%p842_p5), 1, %s703_s10  }
  0x33   : > { %s860_s26 = sshll.u32 (!%p842_p5), %s857_s25, 5  ;;  %s184_s6 = scalar_lea.sflag (!%p842_p5), [#allocation3], %s857_s25 }
  0x34   : > { %s187_s20 = scalar_lea.vmem (!%p842_p5), [#allocation2], %s860_s26 }
  0x37   : > { %686 = dma.done.wait (%p790_p8), %s184_s6, 512  }
  0x38   : > { %688 = vsyncadd (%p790_p8), %s184_s6, 4294966784  ;;  %s193_s5 = scalar_lea.sflag [#allocation6], %s857_s25  ;;  %s196_s18 = scalar_lea.vmem [#allocation5], %s860_s26 }
  0x39   : > { %690 = dma.done.wait (%p790_p8), %s193_s5, 512  }
  0x3a   : > { %692 = vsyncadd (%p790_p8), %s193_s5, 4294966784  ;;  %v232_v0 = vld [vmem:[%s187_s20] sm:$0xff]  ;;  %v233_v1 = vld [vmem:[%s187_s20 + $0x8] sm:$0xff]  ;;  %s895_s21 = scalar_lea.vmem [#allocation7], %s860_s26  ;;  %s490_s19 = sshll.u32 %s711_s12, 9 }
  0x3b   : > { %v234_v2 = vld [vmem:[%s187_s20 + $0x10] sm:$0xff]  ;;  %v874_v3 = vld [vmem:[%s196_s18] sm:$0xff]  ;;  %v876_v4 = vld [vmem:[%s196_s18 + $0x8] sm:$0xff]  ;;  %563 = vlog2.f32 %v232_v0  ;;  %v276_v5 = vsub.f32 1.0, %v232_v0  ;;  %v277_v6 = vsub.f32 1.0, %v233_v1  ;;  %v248_v15 = vmul.f32 %v232_v0, %v232_v0  ;;  %s353_s28 = sshll.u32 %s895_s21, 4  ;;  %s913_s7 = scalar_lea.hbm %s966_s2, %s490_s19  ;;  %s915_s28 = int_to_ptr.vmem [resolvable:$true] %s353_s28 }
  0x3c   : > { %v235_v7 = vld [vmem:[%s187_s20 + $0x18] sm:$0xff]  ;;  %v878_v8 = vld [vmem:[%s196_s18 + $0x10] sm:$0xff]  ;;  %v240_v10 = vmul.f32 %v874_v3, %v232_v0  ;;  %v241_v11 = vmul.f32 %v876_v4, %v233_v1  ;;  %565 = vlog2.f32 %v233_v1  ;;  %v278_v12 = vsub.f32 1.0, %v234_v2  ;;  %s340_s8 = scalar_lea.sflag [#allocation4], %s857_s25  ;;  %s635_s15 = scalar_lea.vmem %s915_s28, 512 }
  0x3d   : > { %v880_v9 = vld [vmem:[%s196_s18 + $0x18] sm:$0xff]  ;;  %v242_v13 = vmul.f32 %v878_v8, %v234_v2  ;;  %567 = vlog2.f32 %v234_v2  ;;  %v249_v17 = vmul.f32 %v233_v1, %v233_v1  ;;  %v250_v18 = vmul.f32 %v234_v2, %v234_v2  ;;  %p636_p8 = scmp.ne.s32.totalorder %s915_s28, %s635_s15  ;;  %s725_s12 = smov [#allocation7]  }
  0x3e   : > { %v243_v14 = vmul.f32 %v880_v9, %v235_v7  ;;  %569 = vlog2.f32 %v235_v7  ;;  %v313_v16 = vadd.f32 %v241_v11, %v240_v10  ;;  %v279_v19 = vsub.f32 1.0, %v235_v7  ;;  %s639_s16 = sshll.u32 %s725_s12, 4  ;;  %s640_s16 = int_to_ptr.vmem [resolvable:$false] %s639_s16 }
  0x3f   : > { %v256_v20 = vmul.f32 %v874_v3, %v874_v3  ;;  %v257_v21 = vmul.f32 %v876_v4, %v876_v4  ;;  %v258_v22 = vmul.f32 %v878_v8, %v878_v8  ;;  %v251_v24 = vmul.f32 %v235_v7, %v235_v7  ;;  %p637_p0 = pnand %p636_p8, %p794_p9  ;;  %s641_s30 = scalar_lea.vmem %s640_s16, 1024 }
  0x40   : > { %v314_v23 = vadd.f32 %v313_v16, %v242_v13  ;;  %v320_v25 = vadd.f32 %v249_v17, %v248_v15  ;;  %571 = vlog2.f32 %v276_v5  ;;  %v259_v26 = vmul.f32 %v880_v9, %v880_v9  ;;  %p642_p5 = scmp.lt.s32.totalorder %s915_s28, %s640_s16  ;;  %p643_p6 = scmp.lt.s32.totalorder %s641_s30, %s635_s15 }
  0x41   : > { %v327_v27 = vadd.f32 %v257_v21, %v256_v20  ;;  %573 = vlog2.f32 %v277_v6  ;;  %v296_v47 = vsub.f32 1.0, %v874_v3  ;;  %v297_v51 = vsub.f32 1.0, %v876_v4  ;;  %p638_p2 = pneg %p637_p0 }
  0x42   : > { %v315_v28 = vadd.f32 %v314_v23, %v243_v14  ;;  %v321_v29 = vadd.f32 %v320_v25, %v250_v18  ;;  %575 = vlog2.f32 %v278_v12  ;;  %v298_v56 = vsub.f32 1.0, %v878_v8  ;;  %p644_p4 = por %p643_p6, %p642_p5 }
  0x43   : > { %v328_v30 = vadd.f32 %v327_v27, %v258_v22  ;;  %577 = vlog2.f32 %v279_v19  ;;  %v299_v60 = vsub.f32 1.0, %v880_v9 }
  0x44   : > { %v322_v31 = vadd.f32 %v321_v29, %v251_v24  ;;  %317 = vst [vmem:[%s895_s21] sm:$0xff] %v315_v28  ;;  %p645_p7 = pnand %p644_p4, %p638_p2 }
  0x45   : > { %v329_v32 = vadd.f32 %v328_v30, %v259_v26 }
  0x46   : > { %478 = vst [vmem:[%s895_s21 + $0x8] sm:$0xff] %v322_v31 }
  0x47   : > { %480 = vst [vmem:[%s895_s21 + $0x10] sm:$0xff] %v329_v32 }
  0x48   : > { %v564_v33 = vpop.eup %563 }
  0x49   : > { %v566_v34 = vpop.eup %565  ;;  %v265_v35 = vmul.f32 0.6931472, %v564_v33 }
  0x4a   : > { %v568_v36 = vpop.eup %567  ;;  %v267_v37 = vmul.f32 0.6931472, %v566_v34 }
  0x4b   : > { %v570_v38 = vpop.eup %569  ;;  %v269_v39 = vmul.f32 0.6931472, %v568_v36  ;;  %v272_v41 = vmax.f32 %v265_v35, -100.0 }
  0x4c   : > { %v271_v40 = vmul.f32 0.6931472, %v570_v38  ;;  %v273_v43 = vmax.f32 %v267_v37, -100.0 }
  0x4d   : > { %v572_v42 = vpop.eup %571  ;;  %v274_v45 = vmax.f32 %v269_v39, -100.0  ;;  %v292_v55 = vmul.f32 %v272_v41, %v874_v3 }
  0x4e   : > { %v574_v44 = vpop.eup %573  ;;  %v281_v46 = vmul.f32 0.6931472, %v572_v42  ;;  %v275_v49 = vmax.f32 %v271_v40, -100.0  ;;  %v293_v59 = vmul.f32 %v273_v43, %v876_v4 }
  0x4f   : > { %v576_v48 = vpop.eup %575  ;;  %v283_v50 = vmul.f32 0.6931472, %v574_v44  ;;  %v294_v62 = vmul.f32 %v274_v45, %v878_v8 }
  0x50   : > { %v578_v52 = vpop.eup %577  ;;  %v285_v53 = vmul.f32 0.6931472, %v576_v48  ;;  %v288_v54 = vmax.f32 %v281_v46, -100.0  ;;  %v295_v1 = vmul.f32 %v275_v49, %v880_v9 }
  0x51   : > { %v287_v57 = vmul.f32 0.6931472, %v578_v52  ;;  %v289_v58 = vmax.f32 %v283_v50, -100.0 }
  0x52   : > { %v290_v61 = vmax.f32 %v285_v53, -100.0  ;;  %v300_v63 = vmul.f32 %v296_v47, %v288_v54 }
  0x53   : > { %v291_v0 = vmax.f32 %v287_v57, -100.0  ;;  %v301_v2 = vmul.f32 %v297_v51, %v289_v58 }
  0x54   : > { %v302_v5 = vmul.f32 %v298_v56, %v290_v61  ;;  %v304_v3 = vadd.f32 %v300_v63, %v292_v55 }
  0x55   : > { %v303_v6 = vmul.f32 %v299_v60, %v291_v0  ;;  %v305_v7 = vadd.f32 %v301_v2, %v293_v59 }
  0x56   : > { %v306_v10 = vadd.f32 %v302_v5, %v294_v62  ;;  %v308_v4 = vsub.f32 0.0, %v304_v3 }
  0x57   : > { %v307_v11 = vadd.f32 %v303_v6, %v295_v1  ;;  %v309_v12 = vsub.f32 0.0, %v305_v7 }
  0x58   : > { %v310_v13 = vsub.f32 0.0, %v306_v10 }
  0x59   : > { %v311_v8 = vsub.f32 0.0, %v307_v11  ;;  %v334_v14 = vadd.f32 %v309_v12, %v308_v4 }
  0x5b   : > { %v335_v15 = vadd.f32 %v334_v14, %v310_v13 }
  0x5d   : > { %v336_v16 = vadd.f32 %v335_v15, %v311_v8 }
  0x5f   : > { %482 = vst [vmem:[%s895_s21 + $0x18] sm:$0xff] %v336_v16 }
  0x60   : > { %648 = shalt.err (!%p645_p7)
}
  0x61   : > { %s649_s4 = scalar_lea.hbm %s913_s7, 512  ;;  %s653_s6 = scalar_lea.hbm %s966_s2, 1024 }
  0x62   : > { %p650_p10 = scmp.ne.s32.totalorder %s913_s7, %s649_s4  ;;  %p654_p3 = scmp.lt.s32.totalorder %s913_s7, %s966_s2 }
  0x63   : > { %p655_p8 = scmp.lt.s32.totalorder %s653_s6, %s649_s4 }
  0x64   : > { %p651_p1 = pnand %p650_p10, %p794_p9 }
  0x65   : > { %p656_p0 = por %p655_p8, %p654_p3 }
  0x66   : > { %p652_p13 = pneg %p651_p1 }
  0x68   : > { %p657_p2 = pnand %p656_p0, %p652_p13 }
  0x6a   : > { %660 = shalt.err (!%p657_p2)
}
  0x6b   : > { %s726_s18 = smov 128   ;;  %s727_s21 = smov 8  }
  0x6c   : > { %495 = dma.vmem_to_hbm [thread:$0]  (%p794_p9), %s915_s28, 512, %s913_s7, %s340_s8, %s726_s18, %s726_s18, %s727_s21  }
  0x6d PF: > { %s368_s19 = sand.u32 1, %s699_s9   ;;  %p505_p5 = pnand %p466_p12, %p801_p11 }
  0x6e   : > { %s369_s29 = scalar_lea.sflag [#allocation4], %s368_s19 }
  0x6f   : > { %p506_p6 = pneg %p505_p5 }
  0x71   : > { %694 = dma.done.wait (%p506_p6), %s369_s29, 512  }
  0x72   : > { %696 = vsyncadd (%p506_p6), %s369_s29, 4294966784  ;;  %s21_s14 = sadd.s32 1, %s719_s14   ;;  %s973_s9 = smov %s703_s10 }
  0x73   : > { %p18_p4 = scmp.ge.s32.totalorder %s21_s14, 4   ;;  %s974_s10 = smov %s707_s11 }
  0x74   : > { %s975_s11 = smov %s799_s23  ;;  %s976_s12 = smov %s715_s13 }
  0x75   : > { %s977_s13 = smov %s979_s17  ;;  %20 = sbr.rel (!%p18_p4) target bundleno = 8 (0x8), region = 93 }
  0x7a   :  { %374 = vsyncpa [#allocation3], 1 }
  0x7b   :  { %376 = vsyncpa [#allocation3 + $0x1], 1 }
  0x7c   :  { %377 = vsyncpa [#allocation6], 1 }
  0x7d   :  { %379 = vsyncpa [#allocation6 + $0x1], 1 }
  0x7e   :  { %380 = vsyncpa [#allocation4], 1 }
  0x7f   :  { %382 = vsyncpa [#allocation4 + $0x1], 1 }

</bundles_post_ra>
